<compile_context>
chip_gen: v7x
topology: tpu7x:2x2x1
jax: 0.10.0
libtpu: 0.0.40
codegen_flags: <defaults>
</compile_context>

<pallas_src>
import jax
import jax.numpy as jnp
import numpy as np
from jax.experimental import pallas as pl
from jax.experimental.pallas import tpu as pltpu


def _kron_matmul_kernel(x_ref, c_ref, o_ref):
    # x_ref: (TM, D)   c_ref: (D, OUT) resident across grid steps   o_ref: (TM, OUT)
    o_ref[...] = jnp.dot(
        x_ref[...], c_ref[...], preferred_element_type=jnp.float32
    ).astype(o_ref.dtype)


def _round_up(n, m):
    return ((n + m - 1) // m) * m


def kronecker_projection(x, A, B, *, tm=512):
    """x: (..., D), A: (D//16, 16), B: (16, OUT//16) -> (..., OUT)."""
    D = x.shape[-1]
    OUT = A.shape[1] * B.shape[1]          # kron(A, B) has 16 * (OUT//16) columns
    assert A.shape[0] * B.shape[0] == D, "kron(A,B) rows must equal feature dim"

    lead = x.shape[:-1]
    M = int(np.prod(lead)) if lead else 1
    x2d = x.reshape(M, D)

    # Precompute the Kronecker matrix once outside the kernel (cheap XLA op);
    # inside the grid it is loaded a single time and pinned in VMEM.
    C = jnp.kron(A, B).astype(x.dtype)     # (D, OUT)

    # Row tile: multiple of 8 (f32 sublane), capped at `tm` (~512 gives ~85% of
    # HBM roofline per measured guidance); small inputs use one full tile.
    TM = min(_round_up(max(M, 1), 8), _round_up(tm, 8))
    Mp = _round_up(M, TM)
    if Mp != M:
        x2d = jnp.pad(x2d, ((0, Mp - M), (0, 0)))

    grid = (Mp // TM,)

    # NOTE: for the small OUT=64 config the output last dim is lane-sparse
    # (masked stores); acceptable here since the kernel is HBM-bound at these
    # sizes. For large D, a factored two-matmul Kronecker form would cut flops,
    # but the dense path keeps the MXU well under its roof for this module.
    out2d = pl.pallas_call(
        _kron_matmul_kernel,
        out_shape=jax.ShapeDtypeStruct((Mp, OUT), x.dtype),
        grid_spec=pltpu.PrefetchScalarGridSpec(
            num_scalar_prefetch=0,
            grid=grid,
            in_specs=[
                pl.BlockSpec((TM, D), lambda i: (i, 0)),   # streamed row tiles
                pl.BlockSpec((D, OUT), lambda i: (0, 0)),  # C resident in VMEM
            ],
            out_specs=pl.BlockSpec((TM, OUT), lambda i: (i, 0)),
        ),
        compiler_params=pltpu.CompilerParams(
            dimension_semantics=("parallel",),
        ),
    )(x2d, C)

    if Mp != M:
        out2d = out2d[:M]
    return out2d.reshape(*lead, OUT)


if __name__ == "__main__":
    # Module hyper-params: input_dimension must be divisible by 16.
    input_dimension = 32
    multiplier = 2
    output_dimension = input_dimension * multiplier  # 64

    key = jax.random.PRNGKey(0)
    k_a, k_b, k_x = jax.random.split(key, 3)

    # Deterministic "randn" parameter init (shapes from __init__).
    A = jax.random.normal(k_a, (input_dimension // 16, 16), dtype=jnp.float32)
    B = jax.random.normal(k_b, (16, output_dimension // 16), dtype=jnp.float32)

    # Small input: (batch, seq, input_dimension)
    x = jax.random.normal(k_x, (2, 8, input_dimension), dtype=jnp.float32)

    out = kronecker_projection(x, A, B)
    out = jax.block_until_ready(out)

    # Pure-JAX reference (same semantics as torch.kron + einsum).
    C_ref = jnp.kron(A, B)
    ref = jnp.einsum("...m,mn->...n", x, C_ref)

    assert out.shape == (2, 8, output_dimension), out.shape
    np.testing.assert_allclose(np.asarray(out), np.asarray(ref), rtol=1e-5, atol=1e-5)

    print("KERNEL_OK")
</pallas_src>

<mosaic_0001>
module attributes {stable_mosaic.version = 11 : i64} {
  func.func @_kron_matmul_kernel(%arg0: i32, %arg1: memref<16x32xf32, #tpu.memory_space<vmem>>, %arg2: memref<32x64xf32, #tpu.memory_space<vmem>>, %arg3: memref<16x64xf32, #tpu.memory_space<vmem>>) attributes {dimension_semantics = [#tpu.dimension_semantics<parallel>], iteration_bounds = array<i64: 1>, scalar_prefetch = 0 : i64, scratch_operands = 0 : i64, tpu.core_type = #tpu.core_type<tc>, window_params = [{transform_indices = @transform_0, window_bounds = array<i64: 16, 32>}, {pipeline_mode = #tpu.pipeline_mode<synchronous>, transform_indices = @transform_1, window_bounds = array<i64: 32, 64>}, {transform_indices = @transform_2, window_bounds = array<i64: 16, 64>}]} {
    %c0 = arith.constant 0 : index
    %c0_0 = arith.constant 0 : index
    %0 = vector.load %arg1[%c0, %c0_0] : memref<16x32xf32, #tpu.memory_space<vmem>>, vector<16x32xf32>
    %c0_1 = arith.constant 0 : index
    %c0_2 = arith.constant 0 : index
    %1 = vector.load %arg2[%c0_1, %c0_2] : memref<32x64xf32, #tpu.memory_space<vmem>>, vector<32x64xf32>
    %cst = arith.constant dense<0.000000e+00> : vector<16x64xf32>
    %2 = tpu.matmul %0, %1, %cst {dimension_numbers = #tpu.dot_dimension_numbers<[1], [0], [0], [1], [0, 0, 1, 1], [], []>} : vector<16x32xf32>, vector<32x64xf32>, vector<16x64xf32> -> vector<16x64xf32>
    %c0_3 = arith.constant 0 : index
    %c0_4 = arith.constant 0 : index
    %3 = vector.load %arg3[%c0_3, %c0_4] : memref<16x64xf32, #tpu.memory_space<vmem>>, vector<16x64xf32>
    tpu.vector_store %arg3[%c0_3, %c0_4], %2 {strides = array<i32>} : memref<16x64xf32, #tpu.memory_space<vmem>>, vector<16x64xf32>,
    return
  }
  func.func @transform_0(%arg0: i32) -> (i32, i32) {
    %c0_i32 = arith.constant 0 : i32
    %c0_i32_0 = arith.constant 0 : i32
    return %arg0, %c0_i32 : i32, i32
  }
  func.func @transform_1(%arg0: i32) -> (i32, i32) {
    %c0_i32 = arith.constant 0 : i32
    %c0_i32_0 = arith.constant 0 : i32
    %c0_i32_1 = arith.constant 0 : i32
    return %c0_i32, %c0_i32_0 : i32, i32
  }
  func.func @transform_2(%arg0: i32) -> (i32, i32) {
    %c0_i32 = arith.constant 0 : i32
    %c0_i32_0 = arith.constant 0 : i32
    return %arg0, %c0_i32 : i32, i32
  }
}

</mosaic_0001>

<bundles_post_ra>
// kernel: tpu_custom_call.1
= control target key start
LH: loop header
LB: loop body
LE: loop exit
PB: predicated region body
PF: predicated region fallthrough
CT: control target
= control target key end

     0   :  { %7 = vsyncpa [#allocation3], 0  ;;  %s318_s0 = inlined_call_operand.hbm [shape: f32[16,32], index: 0, kind: input, shape index: {}]   ;;  %s319_s1 = inlined_call_operand.hbm [shape: f32[32,64], index: 1, kind: input, shape index: {}]   ;;  %s320_s2 = inlined_call_operand.hbm [shape: f32[16,64], index: 2, kind: output, shape index: {}]  }
   0x1   :  { %8 = vsyncpa [#allocation6], 0 }
   0x2   :  { %9 = vsyncpa [#allocation4], 0  ;;  %s253_s9 = smov [#allocation2]   ;;  %s181_s13 = scalar_lea.hbm %s318_s0, 256 }
   0x3   :  { %s15_s10 = sshll.u32 %s253_s9, 4  ;;  %p182_p0 = scmp.ne.s32.totalorder %s318_s0, %s181_s13  ;;  %s16_s10 = int_to_ptr.vmem [resolvable:$true] %s15_s10 }
   0x4   :  { %p185_p1 = scmp.lt.u32.totalorder %s181_s13, %s318_s0 }
   0x6   :  { %p187_p2 = pnand %p185_p1, %p182_p0 }
   0x8   :  { %190 = shalt.err (!%p187_p2)
}
   0x9   :  { %s191_s18 = scalar_lea.vmem %s16_s10, 256  ;;  %p196_p4 = scmp.lt.s32.totalorder %s16_s10, %s16_s10 }
   0xa   :  { %p192_p3 = scmp.ne.s32.totalorder %s16_s10, %s191_s18  ;;  %p197_p5 = scmp.lt.s32.totalorder %s191_s18, %s191_s18 }
   0xc   :  { %p198_p6 = por %p197_p5, %p196_p4 }
   0xe   :  { %p199_p7 = pnand %p198_p6, %p192_p3 }
  0x10   :  { %202 = shalt.err (!%p199_p7)
}
  0x11   :  { %s254_s19 = smov 128   ;;  %s255_s20 = smov 8  }
  0x12   :  { %21 = dma.hbm_to_vmem [thread:$0]  %s318_s0, 256, %s16_s10, [#allocation3], %s254_s19, %s254_s19, %s255_s20  }
  0x13   :  { %s256_s23 = smov [#allocation5]   ;;  %s203_s27 = scalar_lea.hbm %s319_s1, 512 }
  0x14   :  { %s27_s24 = sshll.u32 %s256_s23, 4  ;;  %p204_p8 = scmp.ne.s32.totalorder %s319_s1, %s203_s27  ;;  %s28_s24 = int_to_ptr.vmem [resolvable:$true] %s27_s24 }
  0x15   :  { %p207_p9 = scmp.lt.u32.totalorder %s203_s27, %s319_s1 }
  0x17   :  { %p209_p10 = pnand %p207_p9, %p204_p8 }
  0x19   :  { %212 = shalt.err (!%p209_p10)
}
  0x1a   :  { %s213_s4 = scalar_lea.vmem %s28_s24, 512  ;;  %p218_p12 = scmp.lt.s32.totalorder %s28_s24, %s28_s24 }
  0x1b   :  { %p214_p11 = scmp.ne.s32.totalorder %s28_s24, %s213_s4  ;;  %p219_p13 = scmp.lt.s32.totalorder %s213_s4, %s213_s4 }
  0x1d   :  { %p220_p0 = por %p219_p13, %p218_p12 }
  0x1f   :  { %p221_p1 = pnand %p220_p0, %p214_p11 }
  0x21   :  { %224 = shalt.err (!%p221_p1)
}
  0x22   :  { %33 = dma.hbm_to_vmem [thread:$0]  %s319_s1, 512, %s28_s24, [#allocation6], %s254_s19, %s254_s19, %s255_s20  }
  0x23   :  { %247 = dma.done.wait [#allocation3], 256  }
  0x24   :  { %248 = vsyncadd [#allocation3], 4294967040 }
  0x25   :  { %249 = dma.done.wait [#allocation6], 512  }
  0x26   :  { %250 = vsyncadd [#allocation6], 4294966784  ;;  %vm46_vm0 = vcmask 261120   ;;  %v42_v0 = vld [vmem:[#allocation5] sm:$0xff]  ;;  %v43_v1 = vld [vmem:[#allocation5 + $0x8] sm:$0xff]  ;;  %s257_s1 = smov [#allocation7]  }
  0x27   :  { %v44_v2 = vld [vmem:[#allocation5 + $0x10] sm:$0xff]  ;;  %v168_v3 = vpack.c.bf16 %v43_v1, %v42_v0  ;;  %v45_v4 = vld [vmem:[#allocation5 + $0x18] sm:$0xff]  ;;  %s136_s6 = sshll.u32 %s257_s1, 4  ;;  %vm128_vm1 = vcmask 523264   ;;  %s137_s6 = int_to_ptr.vmem [resolvable:$true] %s136_s6 }
  0x28   :  { %v40_v5 = vld [vmem:[#allocation2] sm:$0xff]  ;;  %v172_v6 = vpack.c.bf16 %v45_v4, %v44_v2  ;;  %v41_v7 = vld [vmem:[#allocation2 + $0x8] sm:$0xff]  ;;  %s225_s7 = scalar_lea.vmem %s137_s6, 256  ;;  %p230_p3 = scmp.lt.s32.totalorder %s137_s6, %s137_s6 }
  0x29   :  { %165 = vmatprep.mubr.msk.f32.mxu0 %vm46_vm0, %v40_v5  ;;  %169 = vmatprep.subr.bf16.mxu0 %v168_v3  ;;  %p226_p2 = scmp.ne.s32.totalorder %s137_s6, %s225_s7  ;;  %p231_p4 = scmp.lt.s32.totalorder %s225_s7, %s225_s7 }
  0x2a   :  { %171 = vmatpush3.bf16.msra.mxu0 %v168_v3 }
  0x2b   :  { %173 = vmatprep.subr.bf16.mxu0 %v172_v6  ;;  %p232_p5 = por %p231_p4, %p230_p3 }
  0x2d   :  { %p233_p6 = pnand %p232_p5, %p226_p2 }
  0x2e   :  { %175 = vmatpush3.bf16.msra.mxu0 %v172_v6 }
  0x31   :  { %166 = vmatmul.mubr.msk.f32.vlgmr.msra.gmra.mrb[0].mxu0 %vm46_vm0, %v41_v7 }
 0x104   :  { %v167_v8 = vpop.f32.mrb[0].mxu0 }
 0x105   :  { %130 = vst.msk [vmem:[#allocation7 + $0x8] sm:$0xff] %vm128_vm1, %v167_v8  ;;  %v119_v9 = vpop.f32.mrb[1].mxu0 }
 0x106   :  { %129 = vst.msk [vmem:[#allocation7] sm:$0xff] %vm128_vm1, %v119_v9 }
 0x107   :  { %236 = shalt.err (!%p233_p6)
}
 0x108   :  { %s237_s10 = scalar_lea.hbm %s320_s2, 256 }
 0x109   :  { %p238_p7 = scmp.ne.s32.totalorder %s320_s2, %s237_s10  ;;  %p241_p8 = scmp.lt.u32.totalorder %s237_s10, %s320_s2 }
 0x10b   :  { %p243_p9 = pnand %p241_p8, %p238_p7 }
 0x10d   :  { %246 = shalt.err (!%p243_p9)
}
 0x10e   :  { %142 = dma.vmem_to_hbm [thread:$0]  %s137_s6, 256, %s320_s2, [#allocation4], %s254_s19, %s254_s19, %s255_s20  }
 0x10f   :  { %251 = dma.done.wait [#allocation4], 256  }
 0x110   :  { %252 = vsyncadd [#allocation4], 4294967040 }
 0x111   :  { %146 = vsyncpa [#allocation3], 1 }
 0x112   :  { %147 = vsyncpa [#allocation6], 1 }
 0x113   :  { %148 = vsyncpa [#allocation4], 1 }

</bundles_post_ra>
